<compile_context>
chip_gen: v6e
topology: v6e:2x2x1
jax: 0.10.0
libtpu: 0.0.40
codegen_flags: <defaults>
</compile_context>

<pallas_src>
import functools

import jax
import jax.numpy as jnp
from jax.experimental import pallas as pl
from jax.experimental.pallas import tpu as pltpu


def _round_up(n, m):
    return (n + m - 1) // m * m


def anxiety_kernel(x_ref, w1_ref, b1_ref, w2_ref, b2_ref, o_ref):
    # pretrained (block-diag): h = xg @ W1_bd   -> (tb, 5G), f32 MXU accumulator.
    h = jnp.dot(x_ref[...], w1_ref[...], preferred_element_type=jnp.float32)
    # ReLU(h + b1) on the f32 accumulator (biases stay f32; no downcast).
    h = jnp.maximum(h + b1_ref[...], 0.0)
    # new_layer (block-diag): out = h @ W2_bd + b2  -> (tb, 4G), f32.
    out = jnp.dot(h, w2_ref[...], preferred_element_type=jnp.float32)
    o_ref[...] = (out + b2_ref[...]).astype(o_ref.dtype)


def prepare_params(w1, b1, w2, b2, *, group=32, x_dtype=jnp.float32):
    """One-time preprocessing (done at init, never on the hot path).

    Builds block-diagonal weights so G consecutive batch rows are processed as
    one lane-dense grouped row:  W_bd = kron(I_G, W^T), biases tiled G times.
    W1 is cast to the activation dtype (bf16 path: bf16 x bf16 MXU, f32 acc);
    W2 / biases stay f32 so the f32 accumulator feeds the 2nd matmul directly.
    """
    w1_t = jnp.asarray(w1, jnp.float32).T                      # (D_IN, 5)
    w2_t = jnp.asarray(w2, jnp.float32).T                      # (5, 4)
    eye = jnp.eye(group, dtype=jnp.float32)
    w1_bd = jnp.kron(eye, w1_t).astype(x_dtype)                # (D_IN*G, 5*G)
    w2_bd = jnp.kron(eye, w2_t)                                # (5*G, 4*G) f32
    b1_g = jnp.tile(jnp.asarray(b1, jnp.float32).reshape(1, -1), (1, group))
    b2_g = jnp.tile(jnp.asarray(b2, jnp.float32).reshape(1, -1), (1, group))
    return w1_bd, b1_g, w2_bd, b2_g


@functools.partial(jax.jit, static_argnames=("tile_rows",))
def anxiety_from_depression(x, params, *, tile_rows=1024):
    """x: (B, D_IN).  params: output of prepare_params().

    tile_rows is in *grouped* rows (each grouped row = G original batch rows);
    the default (1024) is ~2 MiB of f32 x per grid step.
    """
    w1_bd, b1_g, w2_bd, b2_g = params
    B, d_in = x.shape
    g = w1_bd.shape[0] // d_in
    d_hid_g = w1_bd.shape[1]
    d_out_g = w2_bd.shape[1]
    d_out = d_out_g // g

    # Pad the batch only up to the grouping factor (< G extra rows); never to
    # the batch tile.  The common case B % G == 0 is completely copy-free.
    b_grp = _round_up(B, g)
    xg = x if b_grp == B else jnp.pad(x, ((0, b_grp - B), (0, 0)))
    rows = b_grp // g
    xg = xg.reshape(rows, d_in * g)            # free row-major reshape

    # Native sublane tile per dtype (8 f32 / 16 bf16 / 32 int8).
    sub = {4: 8, 2: 16, 1: 32}[jnp.dtype(x.dtype).itemsize]
    # Largest tile the budget allows, but keep >= 2 grid steps so both v7x
    # TensorCores get work under the "parallel" batch axis.
    tb = min(_round_up(tile_rows, sub),
             _round_up(max(-(-rows // 2), 1), sub))
    tb = max(tb, sub)
    grid = pl.cdiv(rows, tb)                   # ragged last block is masked

    out = pl.pallas_call(
        anxiety_kernel,
        out_shape=jax.ShapeDtypeStruct((rows, d_out_g), x.dtype),
        grid_spec=pltpu.PrefetchScalarGridSpec(
            num_scalar_prefetch=0,
            grid=(grid,),
            in_specs=[
                # x: tiled over grouped rows -> double-buffered pipeline,
                # lane-dense (d_in*G = 512 lanes with G=32).
                pl.BlockSpec((tb, d_in * g), lambda i: (i, 0)),
                # Weights / biases: constant index_map -> fetched once,
                # effectively VMEM-resident across the grid.
                pl.BlockSpec(w1_bd.shape, lambda i: (0, 0)),
                pl.BlockSpec((1, d_hid_g), lambda i: (0, 0)),
                pl.BlockSpec(w2_bd.shape, lambda i: (0, 0)),
                pl.BlockSpec((1, d_out_g), lambda i: (0, 0)),
            ],
            # Output: (tb, 4*G) = (tb, 128) with G=32 -> unmasked full-lane
            # stores (the single biggest measured lever per the perf review).
            out_specs=pl.BlockSpec((tb, d_out_g), lambda i: (i, 0)),
        ),
        compiler_params=pltpu.CompilerParams(
            dimension_semantics=("parallel",),
            # Raise v5e's 16 MiB default scoped VMEM; default tile needs ~6 MiB
            # double-buffered, comfortably under v7x's 64 MiB physical VMEM.
            vmem_limit_bytes=32 * 1024 * 1024),
    )(xg, w1_bd, b1_g, w2_bd, b2_g)

    out = out.reshape(b_grp, d_out)            # free row-major reshape
    return out if b_grp == B else out[:B]


def _linear_init(key, out_features, in_features):
    """Deterministic PyTorch-style (uniform +/- 1/sqrt(fan_in)) init."""
    kw, kb = jax.random.split(key)
    bound = 1.0 / jnp.sqrt(in_features)
    w = jax.random.uniform(kw, (out_features, in_features),
                           minval=-bound, maxval=bound, dtype=jnp.float32)
    b = jax.random.uniform(kb, (out_features,),
                           minval=-bound, maxval=bound, dtype=jnp.float32)
    return w, b


def reference(x, w1, b1, w2, b2):
    h = jnp.maximum(x @ w1.T + b1, 0.0)
    return h @ w2.T + b2


if __name__ == "__main__":
    D_IN, D_HID, D_OUT, G = 16, 5, 4, 32
    key = jax.random.PRNGKey(0)
    kx, k1, k2 = jax.random.split(key, 3)

    # Synthetic "pretrained" backbone: Linear(D_IN -> 5); new_layer: Linear(5 -> 4).
    w1, b1 = _linear_init(k1, D_HID, D_IN)
    w2, b2 = _linear_init(k2, D_OUT, D_HID)

    params_f32 = prepare_params(w1, b1, w2, b2, group=G)

    # --- Test 1: B multiple of G (copy-free path), multi-step grid, f32 ---
    B1 = 512
    x1 = jax.random.normal(kx, (B1, D_IN), dtype=jnp.float32)
    out1 = jax.block_until_ready(anxiety_from_depression(x1, params_f32))
    ref1 = reference(x1, w1, b1, w2, b2)
    assert out1.shape == (B1, D_OUT), out1.shape
    assert jnp.allclose(out1, ref1, atol=1e-5, rtol=1e-5), "f32 mismatch"

    # --- Test 2: B not a multiple of G -> small pad + ragged last grid block ---
    B2 = 1100
    x2 = jax.random.normal(jax.random.fold_in(kx, 1), (B2, D_IN),
                           dtype=jnp.float32)
    out2 = jax.block_until_ready(
        anxiety_from_depression(x2, params_f32, tile_rows=8))
    ref2 = reference(x2, w1, b1, w2, b2)
    assert out2.shape == (B2, D_OUT), out2.shape
    assert jnp.allclose(out2, ref2, atol=1e-5, rtol=1e-5), "tail mismatch"

    # --- Test 3: bf16 activations (half HBM traffic); f32 acc & f32 hidden ---
    params_bf16 = prepare_params(w1, b1, w2, b2, group=G, x_dtype=jnp.bfloat16)
    B3 = 512
    x3 = jax.random.normal(jax.random.fold_in(kx, 2), (B3, D_IN),
                           dtype=jnp.float32)
    out3 = jax.block_until_ready(
        anxiety_from_depression(x3.astype(jnp.bfloat16), params_bf16))
    ref3 = reference(x3, w1, b1, w2, b2)
    assert out3.shape == (B3, D_OUT), out3.shape
    assert jnp.allclose(out3.astype(jnp.float32), ref3, atol=5e-2, rtol=5e-2), \
        "bf16 mismatch"

    print("KERNEL_OK")
</pallas_src>

<mosaic_0001>
module attributes {stable_mosaic.version = 11 : i64} {
  func.func @anxiety_kernel(%arg0: i32, %arg1: memref<8x512xf32, #tpu.memory_space<vmem>>, %arg2: memref<512x160xf32, #tpu.memory_space<vmem>>, %arg3: memref<1x160xf32, #tpu.memory_space<vmem>>, %arg4: memref<160x128xf32, #tpu.memory_space<vmem>>, %arg5: memref<1x128xf32, #tpu.memory_space<vmem>>, %arg6: memref<8x128xf32, #tpu.memory_space<vmem>>) attributes {dimension_semantics = [#tpu.dimension_semantics<parallel>], iteration_bounds = array<i64: 2>, scalar_prefetch = 0 : i64, scratch_operands = 0 : i64, tpu.core_type = #tpu.core_type<tc>, window_params = [{transform_indices = @transform_0, window_bounds = array<i64: 8, 512>}, {pipeline_mode = #tpu.pipeline_mode<synchronous>, transform_indices = @transform_1, window_bounds = array<i64: 512, 160>}, {pipeline_mode = #tpu.pipeline_mode<synchronous>, transform_indices = @transform_2, window_bounds = array<i64: 1, 160>}, {pipeline_mode = #tpu.pipeline_mode<synchronous>, transform_indices = @transform_3, window_bounds = array<i64: 160, 128>}, {pipeline_mode = #tpu.pipeline_mode<synchronous>, transform_indices = @transform_4, window_bounds = array<i64: 1, 128>}, {transform_indices = @transform_5, window_bounds = array<i64: 8, 128>}]} {
    %c0 = arith.constant 0 : index
    %c0_0 = arith.constant 0 : index
    %0 = vector.load %arg1[%c0, %c0_0] : memref<8x512xf32, #tpu.memory_space<vmem>>, vector<8x512xf32>
    %c0_1 = arith.constant 0 : index
    %c0_2 = arith.constant 0 : index
    %1 = vector.load %arg2[%c0_1, %c0_2] : memref<512x160xf32, #tpu.memory_space<vmem>>, vector<512x160xf32>
    %cst = arith.constant dense<0.000000e+00> : vector<8x160xf32>
    %2 = tpu.matmul %0, %1, %cst {dimension_numbers = #tpu.dot_dimension_numbers<[1], [0], [0], [1], [0, 0, 1, 1], [], []>} : vector<8x512xf32>, vector<512x160xf32>, vector<8x160xf32> -> vector<8x160xf32>
    %c0_3 = arith.constant 0 : index
    %c0_4 = arith.constant 0 : index
    %3 = vector.load %arg3[%c0_3, %c0_4] : memref<1x160xf32, #tpu.memory_space<vmem>>, vector<1x160xf32>
    %4 = vector.broadcast %3 : vector<1x160xf32> to vector<8x160xf32>
    %5 = arith.addf %2, %4 : vector<8x160xf32>
    %cst_5 = arith.constant 0.000000e+00 : f32
    %6 = vector.broadcast %cst_5 : f32 to vector<8x160xf32>
    %7 = arith.maximumf %5, %6 : vector<8x160xf32>
    %c0_6 = arith.constant 0 : index
    %c0_7 = arith.constant 0 : index
    %8 = vector.load %arg4[%c0_6, %c0_7] : memref<160x128xf32, #tpu.memory_space<vmem>>, vector<160x128xf32>
    %cst_8 = arith.constant dense<0.000000e+00> : vector<8x128xf32>
    %9 = tpu.matmul %7, %8, %cst_8 {dimension_numbers = #tpu.dot_dimension_numbers<[1], [0], [0], [1], [0, 0, 1, 1], [], []>} : vector<8x160xf32>, vector<160x128xf32>, vector<8x128xf32> -> vector<8x128xf32>
    %c0_9 = arith.constant 0 : index
    %c0_10 = arith.constant 0 : index
    %10 = vector.load %arg5[%c0_9, %c0_10] : memref<1x128xf32, #tpu.memory_space<vmem>>, vector<1x128xf32>
    %11 = vector.broadcast %10 : vector<1x128xf32> to vector<8x128xf32>
    %12 = arith.addf %9, %11 : vector<8x128xf32>
    %c0_11 = arith.constant 0 : index
    %c0_12 = arith.constant 0 : index
    %13 = vector.load %arg6[%c0_11, %c0_12] : memref<8x128xf32, #tpu.memory_space<vmem>>, vector<8x128xf32>
    tpu.vector_store %arg6[%c0_11, %c0_12], %12 {strides = array<i32>} : memref<8x128xf32, #tpu.memory_space<vmem>>, vector<8x128xf32>,
    return
  }
  func.func @transform_0(%arg0: i32) -> (i32, i32) {
    %c0_i32 = arith.constant 0 : i32
    %c0_i32_0 = arith.constant 0 : i32
    return %arg0, %c0_i32 : i32, i32
  }
  func.func @transform_1(%arg0: i32) -> (i32, i32) {
    %c0_i32 = arith.constant 0 : i32
    %c0_i32_0 = arith.constant 0 : i32
    %c0_i32_1 = arith.constant 0 : i32
    return %c0_i32, %c0_i32_0 : i32, i32
  }
  func.func @transform_2(%arg0: i32) -> (i32, i32) {
    %c0_i32 = arith.constant 0 : i32
    %c0_i32_0 = arith.constant 0 : i32
    %c0_i32_1 = arith.constant 0 : i32
    return %c0_i32, %c0_i32_0 : i32, i32
  }
  func.func @transform_3(%arg0: i32) -> (i32, i32) {
    %c0_i32 = arith.constant 0 : i32
    %c0_i32_0 = arith.constant 0 : i32
    %c0_i32_1 = arith.constant 0 : i32
    return %c0_i32, %c0_i32_0 : i32, i32
  }
  func.func @transform_4(%arg0: i32) -> (i32, i32) {
    %c0_i32 = arith.constant 0 : i32
    %c0_i32_0 = arith.constant 0 : i32
    %c0_i32_1 = arith.constant 0 : i32
    return %c0_i32, %c0_i32_0 : i32, i32
  }
  func.func @transform_5(%arg0: i32) -> (i32, i32) {
    %c0_i32 = arith.constant 0 : i32
    %c0_i32_0 = arith.constant 0 : i32
    return %arg0, %c0_i32 : i32, i32
  }
}

</mosaic_0001>

<bundles_post_ra>
// kernel: anxiety_from_depression.1
= control target key start
LH: loop header
LB: loop body
LE: loop exit
PB: predicated region body
PF: predicated region fallthrough
CT: control target
= control target key end

     0   :  { %s727_s18 = smov 0   ;;  %s1208_s0 = inlined_call_operand.vmem [shape: f32[16,512], index: 0, kind: input, shape index: {}]   ;;  %s1209_s1 = inlined_call_operand.vmem [shape: f32[512,160], index: 1, kind: input, shape index: {}]   ;;  %s1210_s2 = inlined_call_operand.vmem [shape: f32[1,160], index: 2, kind: input, shape index: {}]   ;;  %s1211_s3 = inlined_call_operand.vmem [shape: f32[160,128], index: 3, kind: input, shape index: {}]   ;;  %s1212_s4 = inlined_call_operand.vmem [shape: f32[1,128], index: 4, kind: input, shape index: {}]   ;;  %s1213_s5 = inlined_call_operand.vmem [shape: f32[16,128], index: 5, kind: output, shape index: {}]  }
   0x1 LB: > { %s666_s19 = sadd.s32 4294967295, %s694_s18   ;;  %p670_p0 = scmp.ge.s32.totalorder %s694_s18, 1  ;;  %s694_s18 = sphi %s727_s18, %s15_s18  }
   0x2   : > { %p187_p1 = scmp.lt.s32.totalorder %s694_s18, 3 }
   0x4   : > { %p188_p2 = pnand %p670_p0, %p187_p1 }
   0x5   : > { %p1037_p3 = scmp.lt.s32.totalorder (!%p188_p2), %s666_s19, 1 }
   0x6   : > { %191 = sbr.rel (%p188_p2) target bundleno = 475 (0x1db), region = 40 }
   0xb   : > { %v258_v0 = vld [vmem:[%s1209_s1 + $0xf8] sm:$0xff]  ;;  %v257_v2 = vld [vmem:[%s1209_s1 + $0xf0] sm:$0xff]  ;;  %v256_v4 = vld [vmem:[%s1209_s1 + $0xe8] sm:$0xff]  ;;  %s1216_s19 = smov (!%p1037_p3, %s666_s19), 1  ;;  %vm538_vm0 = vcmask 261120  }
   0xc   : > { %v322_v1 = vld [vmem:[%s1209_s1 + $0x2f8] sm:$0xff]  ;;  %367 = vmatprep.subr.mxu0 %v258_v0  ;;  %v321_v3 = vld [vmem:[%s1209_s1 + $0x2f0] sm:$0xff]  ;;  %v320_v5 = vld [vmem:[%s1209_s1 + $0x2e8] sm:$0xff]  ;;  %s678_s23 = sshll.u32 %s1216_s19, 5 }
   0xd   : > { %438 = vmatprep.subr.mxu1 %v322_v1  ;;  %368 = vmatpush1.msra.mxu0 %v257_v2  ;;  %v255_v6 = vld [vmem:[%s1209_s1 + $0xe0] sm:$0xff]  ;;  %v254_v8 = vld [vmem:[%s1209_s1 + $0xd8] sm:$0xff]  ;;  %v253_v10 = vld [vmem:[%s1209_s1 + $0xd0] sm:$0xff]  ;;  %s218_s13 = scalar_lea.vmem %s1208_s0, %s678_s23  ;;  %s673_s23 = sshll.u32 %s1216_s19, 3 }
   0xe   : > { %439 = vmatpush1.msra.mxu1 %v321_v3  ;;  %v319_v7 = vld [vmem:[%s1209_s1 + $0x2e0] sm:$0xff]  ;;  %369 = vmatprep.subr.mxu0 %v256_v4  ;;  %v318_v9 = vld [vmem:[%s1209_s1 + $0x2d8] sm:$0xff]  ;;  %v317_v11 = vld [vmem:[%s1209_s1 + $0x2d0] sm:$0xff]  ;;  %s222_s29 = scalar_lea.vmem %s1213_s5, %s673_s23 }
   0xf   : > { %440 = vmatprep.subr.mxu1 %v320_v5  ;;  %370 = vmatpush1.msra.mxu0 %v255_v6  ;;  %v252_v12 = vld [vmem:[%s1209_s1 + $0xc8] sm:$0xff]  ;;  %v251_v14 = vld [vmem:[%s1209_s1 + $0xc0] sm:$0xff]  ;;  %v250_v16 = vld [vmem:[%s1209_s1 + $0xb8] sm:$0xff] }
  0x10   : > { %441 = vmatpush1.msra.mxu1 %v319_v7  ;;  %v316_v13 = vld [vmem:[%s1209_s1 + $0x2c8] sm:$0xff]  ;;  %371 = vmatprep.subr.mxu0 %v254_v8  ;;  %v315_v15 = vld [vmem:[%s1209_s1 + $0x2c0] sm:$0xff]  ;;  %v314_v17 = vld [vmem:[%s1209_s1 + $0x2b8] sm:$0xff] }
  0x11   : > { %442 = vmatprep.subr.mxu1 %v318_v9  ;;  %372 = vmatpush1.msra.mxu0 %v253_v10  ;;  %v249_v18 = vld [vmem:[%s1209_s1 + $0xb0] sm:$0xff]  ;;  %v248_v20 = vld [vmem:[%s1209_s1 + $0xa8] sm:$0xff]  ;;  %v247_v22 = vld [vmem:[%s1209_s1 + $0xa0] sm:$0xff] }
  0x12   : > { %443 = vmatpush1.msra.mxu1 %v317_v11  ;;  %373 = vmatprep.subr.mxu0 %v252_v12  ;;  %v313_v19 = vld [vmem:[%s1209_s1 + $0x2b0] sm:$0xff]  ;;  %v312_v21 = vld [vmem:[%s1209_s1 + $0x2a8] sm:$0xff]  ;;  %v311_v23 = vld [vmem:[%s1209_s1 + $0x2a0] sm:$0xff] }
  0x13   : > { %444 = vmatprep.subr.mxu1 %v316_v13  ;;  %374 = vmatpush1.msra.mxu0 %v251_v14  ;;  %v246_v24 = vld [vmem:[%s1209_s1 + $0x98] sm:$0xff]  ;;  %v245_v26 = vld [vmem:[%s1209_s1 + $0x90] sm:$0xff]  ;;  %v244_v28 = vld [vmem:[%s1209_s1 + $0x88] sm:$0xff] }
  0x14   : > { %445 = vmatpush1.msra.mxu1 %v315_v15  ;;  %375 = vmatprep.subr.mxu0 %v250_v16  ;;  %v310_v25 = vld [vmem:[%s1209_s1 + $0x298] sm:$0xff]  ;;  %v309_v27 = vld [vmem:[%s1209_s1 + $0x290] sm:$0xff]  ;;  %v308_v29 = vld [vmem:[%s1209_s1 + $0x288] sm:$0xff] }
  0x15   : > { %446 = vmatprep.subr.mxu1 %v314_v17  ;;  %376 = vmatpush1.msra.mxu0 %v249_v18  ;;  %v243_v30 = vld [vmem:[%s1209_s1 + $0x80] sm:$0xff]  ;;  %v242_v32 = vld [vmem:[%s1209_s1 + $0x78] sm:$0xff]  ;;  %v241_v34 = vld [vmem:[%s1209_s1 + $0x70] sm:$0xff] }
  0x16   : > { %447 = vmatpush1.msra.mxu1 %v313_v19  ;;  %377 = vmatprep.subr.mxu0 %v248_v20  ;;  %v307_v31 = vld [vmem:[%s1209_s1 + $0x280] sm:$0xff]  ;;  %v306_v33 = vld [vmem:[%s1209_s1 + $0x278] sm:$0xff]  ;;  %v305_v35 = vld [vmem:[%s1209_s1 + $0x270] sm:$0xff] }
  0x17   : > { %448 = vmatprep.subr.mxu1 %v312_v21  ;;  %378 = vmatpush1.msra.mxu0 %v247_v22  ;;  %v240_v36 = vld [vmem:[%s1209_s1 + $0x68] sm:$0xff]  ;;  %v239_v38 = vld [vmem:[%s1209_s1 + $0x60] sm:$0xff]  ;;  %v238_v40 = vld [vmem:[%s1209_s1 + $0x58] sm:$0xff] }
  0x18   : > { %449 = vmatpush1.msra.mxu1 %v311_v23  ;;  %379 = vmatprep.subr.mxu0 %v246_v24  ;;  %v304_v37 = vld [vmem:[%s1209_s1 + $0x268] sm:$0xff]  ;;  %v303_v39 = vld [vmem:[%s1209_s1 + $0x260] sm:$0xff]  ;;  %v302_v41 = vld [vmem:[%s1209_s1 + $0x258] sm:$0xff] }
  0x19   : > { %450 = vmatprep.subr.mxu1 %v310_v25  ;;  %380 = vmatpush1.msra.mxu0 %v245_v26  ;;  %v237_v42 = vld [vmem:[%s1209_s1 + $0x50] sm:$0xff]  ;;  %v236_v44 = vld [vmem:[%s1209_s1 + $0x48] sm:$0xff]  ;;  %v235_v46 = vld [vmem:[%s1209_s1 + $0x40] sm:$0xff] }
  0x1a   : > { %451 = vmatpush1.msra.mxu1 %v309_v27  ;;  %381 = vmatprep.subr.mxu0 %v244_v28  ;;  %v301_v43 = vld [vmem:[%s1209_s1 + $0x250] sm:$0xff]  ;;  %v300_v45 = vld [vmem:[%s1209_s1 + $0x248] sm:$0xff]  ;;  %v299_v47 = vld [vmem:[%s1209_s1 + $0x240] sm:$0xff] }
  0x1b   : > { %452 = vmatprep.subr.mxu1 %v308_v29  ;;  %382 = vmatpush1.msra.mxu0 %v243_v30  ;;  %v234_v48 = vld [vmem:[%s1209_s1 + $0x38] sm:$0xff]  ;;  %v233_v50 = vld [vmem:[%s1209_s1 + $0x30] sm:$0xff]  ;;  %v232_v52 = vld [vmem:[%s1209_s1 + $0x28] sm:$0xff] }
  0x1c   : > { %453 = vmatpush1.msra.mxu1 %v307_v31  ;;  %383 = vmatprep.subr.mxu0 %v242_v32  ;;  %v298_v49 = vld [vmem:[%s1209_s1 + $0x238] sm:$0xff]  ;;  %v297_v51 = vld [vmem:[%s1209_s1 + $0x230] sm:$0xff]  ;;  %v296_v53 = vld [vmem:[%s1209_s1 + $0x228] sm:$0xff] }
  0x1d   : > { %454 = vmatprep.subr.mxu1 %v306_v33  ;;  %384 = vmatpush1.msra.mxu0 %v241_v34  ;;  %v231_v54 = vld [vmem:[%s1209_s1 + $0x20] sm:$0xff]  ;;  %v230_v56 = vld [vmem:[%s1209_s1 + $0x18] sm:$0xff]  ;;  %v229_v58 = vld [vmem:[%s1209_s1 + $0x10] sm:$0xff] }
  0x1e   : > { %455 = vmatpush1.msra.mxu1 %v305_v35  ;;  %385 = vmatprep.subr.mxu0 %v240_v36  ;;  %v295_v55 = vld [vmem:[%s1209_s1 + $0x220] sm:$0xff]  ;;  %v294_v57 = vld [vmem:[%s1209_s1 + $0x218] sm:$0xff]  ;;  %v293_v59 = vld [vmem:[%s1209_s1 + $0x210] sm:$0xff] }
  0x1f   : > { %456 = vmatprep.subr.mxu1 %v304_v37  ;;  %386 = vmatpush1.msra.mxu0 %v239_v38  ;;  %v228_v60 = vld [vmem:[%s1209_s1 + $0x8] sm:$0xff]  ;;  %v227_v62 = vld [vmem:[%s1209_s1] sm:$0xff]  ;;  %v290_v0 = vld [vmem:[%s1209_s1 + $0x1f8] sm:$0xff] }
  0x20   : > { %457 = vmatpush1.msra.mxu1 %v303_v39  ;;  %387 = vmatprep.subr.mxu0 %v238_v40  ;;  %v292_v61 = vld [vmem:[%s1209_s1 + $0x208] sm:$0xff]  ;;  %v291_v63 = vld [vmem:[%s1209_s1 + $0x200] sm:$0xff]  ;;  %v354_v1 = vld [vmem:[%s1209_s1 + $0x3f8] sm:$0xff] }
  0x21   : > { %458 = vmatprep.subr.mxu1 %v302_v41  ;;  %388 = vmatpush1.msra.mxu0 %v237_v42  ;;  %v289_v2 = vld [vmem:[%s1209_s1 + $0x1f0] sm:$0xff]  ;;  %v288_v4 = vld [vmem:[%s1209_s1 + $0x1e8] sm:$0xff]  ;;  %v287_v6 = vld [vmem:[%s1209_s1 + $0x1e0] sm:$0xff] }
  0x22   : > { %459 = vmatpush1.msra.mxu1 %v301_v43  ;;  %389 = vmatprep.subr.mxu0 %v236_v44  ;;  %v353_v3 = vld [vmem:[%s1209_s1 + $0x3f0] sm:$0xff]  ;;  %v352_v5 = vld [vmem:[%s1209_s1 + $0x3e8] sm:$0xff]  ;;  %v351_v7 = vld [vmem:[%s1209_s1 + $0x3e0] sm:$0xff] }
  0x23   : > { %460 = vmatprep.subr.mxu1 %v300_v45  ;;  %390 = vmatpush1.msra.mxu0 %v235_v46  ;;  %v286_v8 = vld [vmem:[%s1209_s1 + $0x1d8] sm:$0xff]  ;;  %v285_v10 = vld [vmem:[%s1209_s1 + $0x1d0] sm:$0xff]  ;;  %v284_v12 = vld [vmem:[%s1209_s1 + $0x1c8] sm:$0xff] }
  0x24   : > { %461 = vmatpush1.msra.mxu1 %v299_v47  ;;  %391 = vmatprep.subr.mxu0 %v234_v48  ;;  %v350_v9 = vld [vmem:[%s1209_s1 + $0x3d8] sm:$0xff]  ;;  %v349_v11 = vld [vmem:[%s1209_s1 + $0x3d0] sm:$0xff]  ;;  %v348_v13 = vld [vmem:[%s1209_s1 + $0x3c8] sm:$0xff] }
  0x25   : > { %462 = vmatprep.subr.mxu1 %v298_v49  ;;  %392 = vmatpush1.msra.mxu0 %v233_v50  ;;  %v283_v14 = vld [vmem:[%s1209_s1 + $0x1c0] sm:$0xff]  ;;  %v282_v16 = vld [vmem:[%s1209_s1 + $0x1b8] sm:$0xff]  ;;  %v281_v18 = vld [vmem:[%s1209_s1 + $0x1b0] sm:$0xff] }
  0x26   : > { %463 = vmatpush1.msra.mxu1 %v297_v51  ;;  %393 = vmatprep.subr.mxu0 %v232_v52  ;;  %v347_v15 = vld [vmem:[%s1209_s1 + $0x3c0] sm:$0xff]  ;;  %v346_v17 = vld [vmem:[%s1209_s1 + $0x3b8] sm:$0xff]  ;;  %v345_v19 = vld [vmem:[%s1209_s1 + $0x3b0] sm:$0xff] }
  0x27   : > { %464 = vmatprep.subr.mxu1 %v296_v53  ;;  %394 = vmatpush1.msra.mxu0 %v231_v54  ;;  %v280_v20 = vld [vmem:[%s1209_s1 + $0x1a8] sm:$0xff]  ;;  %v279_v22 = vld [vmem:[%s1209_s1 + $0x1a0] sm:$0xff]  ;;  %v278_v24 = vld [vmem:[%s1209_s1 + $0x198] sm:$0xff] }
  0x28   : > { %465 = vmatpush1.msra.mxu1 %v295_v55  ;;  %395 = vmatprep.subr.mxu0 %v230_v56  ;;  %v344_v21 = vld [vmem:[%s1209_s1 + $0x3a8] sm:$0xff]  ;;  %v343_v23 = vld [vmem:[%s1209_s1 + $0x3a0] sm:$0xff]  ;;  %v342_v25 = vld [vmem:[%s1209_s1 + $0x398] sm:$0xff] }
  0x29   : > { %466 = vmatprep.subr.mxu1 %v294_v57  ;;  %396 = vmatpush1.msra.mxu0 %v229_v58  ;;  %v277_v26 = vld [vmem:[%s1209_s1 + $0x190] sm:$0xff]  ;;  %v276_v28 = vld [vmem:[%s1209_s1 + $0x188] sm:$0xff]  ;;  %v275_v30 = vld [vmem:[%s1209_s1 + $0x180] sm:$0xff] }
  0x2a   : > { %467 = vmatpush1.msra.mxu1 %v293_v59  ;;  %397 = vmatprep.subr.mxu0 %v228_v60  ;;  %v341_v27 = vld [vmem:[%s1209_s1 + $0x390] sm:$0xff]  ;;  %v340_v29 = vld [vmem:[%s1209_s1 + $0x388] sm:$0xff]  ;;  %v339_v31 = vld [vmem:[%s1209_s1 + $0x380] sm:$0xff] }
  0x2b   : > { %468 = vmatprep.subr.mxu1 %v292_v61  ;;  %398 = vmatpush1.msra.mxu0 %v227_v62  ;;  %v274_v32 = vld [vmem:[%s1209_s1 + $0x178] sm:$0xff]  ;;  %v273_v34 = vld [vmem:[%s1209_s1 + $0x170] sm:$0xff]  ;;  %v272_v36 = vld [vmem:[%s1209_s1 + $0x168] sm:$0xff] }
  0x2c   : > { %469 = vmatpush1.msra.mxu1 %v291_v63  ;;  %399 = vmatprep.subr.mxu0 %v290_v0  ;;  %v338_v33 = vld [vmem:[%s1209_s1 + $0x378] sm:$0xff]  ;;  %v337_v35 = vld [vmem:[%s1209_s1 + $0x370] sm:$0xff]  ;;  %v336_v37 = vld [vmem:[%s1209_s1 + $0x368] sm:$0xff] }
  0x2d   : > { %470 = vmatprep.subr.mxu1 %v354_v1  ;;  %400 = vmatpush2.msra.mxu0 %v289_v2  ;;  %v271_v38 = vld [vmem:[%s1209_s1 + $0x160] sm:$0xff]  ;;  %v270_v40 = vld [vmem:[%s1209_s1 + $0x158] sm:$0xff]  ;;  %v269_v42 = vld [vmem:[%s1209_s1 + $0x150] sm:$0xff] }
  0x2e   : > { %471 = vmatpush2.msra.mxu1 %v353_v3  ;;  %401 = vmatprep.subr.mxu0 %v288_v4  ;;  %v335_v39 = vld [vmem:[%s1209_s1 + $0x360] sm:$0xff]  ;;  %v334_v41 = vld [vmem:[%s1209_s1 + $0x358] sm:$0xff]  ;;  %v333_v43 = vld [vmem:[%s1209_s1 + $0x350] sm:$0xff] }
  0x2f   : > { %472 = vmatprep.subr.mxu1 %v352_v5  ;;  %402 = vmatpush2.msra.mxu0 %v287_v6  ;;  %v268_v44 = vld [vmem:[%s1209_s1 + $0x148] sm:$0xff]  ;;  %v267_v46 = vld [vmem:[%s1209_s1 + $0x140] sm:$0xff]  ;;  %v266_v48 = vld [vmem:[%s1209_s1 + $0x138] sm:$0xff]  ;;  %v696_v5 = vmov 0.0  }
  0x30   : > { %473 = vmatpush2.msra.mxu1 %v351_v7  ;;  %403 = vmatprep.subr.mxu0 %v286_v8  ;;  %v332_v45 = vld [vmem:[%s1209_s1 + $0x348] sm:$0xff]  ;;  %v331_v47 = vld [vmem:[%s1209_s1 + $0x340] sm:$0xff]  ;;  %v330_v49 = vld [vmem:[%s1209_s1 + $0x338] sm:$0xff] }
  0x31   : > { %474 = vmatprep.subr.mxu1 %v350_v9  ;;  %404 = vmatpush2.msra.mxu0 %v285_v10  ;;  %v265_v50 = vld [vmem:[%s1209_s1 + $0x130] sm:$0xff]  ;;  %v264_v52 = vld [vmem:[%s1209_s1 + $0x128] sm:$0xff]  ;;  %v263_v54 = vld [vmem:[%s1209_s1 + $0x120] sm:$0xff] }
  0x32   : > { %475 = vmatpush2.msra.mxu1 %v349_v11  ;;  %405 = vmatprep.subr.mxu0 %v284_v12  ;;  %v329_v51 = vld [vmem:[%s1209_s1 + $0x330] sm:$0xff]  ;;  %v328_v53 = vld [vmem:[%s1209_s1 + $0x328] sm:$0xff]  ;;  %v327_v55 = vld [vmem:[%s1209_s1 + $0x320] sm:$0xff] }
  0x33   : > { %476 = vmatprep.subr.mxu1 %v348_v13  ;;  %406 = vmatpush2.msra.mxu0 %v283_v14  ;;  %v262_v56 = vld [vmem:[%s1209_s1 + $0x118] sm:$0xff]  ;;  %v261_v58 = vld [vmem:[%s1209_s1 + $0x110] sm:$0xff]  ;;  %v260_v60 = vld [vmem:[%s1209_s1 + $0x108] sm:$0xff] }
  0x34   : > { %477 = vmatpush2.msra.mxu1 %v347_v15  ;;  %407 = vmatprep.subr.mxu0 %v282_v16  ;;  %v326_v57 = vld [vmem:[%s1209_s1 + $0x318] sm:$0xff]  ;;  %v325_v59 = vld [vmem:[%s1209_s1 + $0x310] sm:$0xff]  ;;  %v324_v61 = vld [vmem:[%s1209_s1 + $0x308] sm:$0xff] }
  0x35   : > { %478 = vmatprep.subr.mxu1 %v346_v17  ;;  %408 = vmatpush2.msra.mxu0 %v281_v18  ;;  %v259_v62 = vld [vmem:[%s1209_s1 + $0x100] sm:$0xff]  ;;  %v224_v63 = vld [vmem:[%s218_s13 + $0x8] sm:$0xff]  ;;  %v226_v1 = vld [vmem:[%s218_s13 + $0x18] sm:$0xff] }
  0x36   : > { %479 = vmatpush2.msra.mxu1 %v345_v19  ;;  %409 = vmatprep.subr.mxu0 %v280_v20  ;;  %v323_v0 = vld [vmem:[%s1209_s1 + $0x300] sm:$0xff]  ;;  %v225_v3 = vld [vmem:[%s218_s13 + $0x10] sm:$0xff]  ;;  %v526_v4 = vld [vmem:[%s1211_s3 + $0x78] sm:$0xff] }
  0x37   : > { %480 = vmatprep.subr.mxu1 %v344_v21  ;;  %410 = vmatpush2.msra.mxu0 %v279_v22  ;;  %v223_v2 = vld [vmem:[%s218_s13] sm:$0xff]  ;;  %v525_v6 = vld [vmem:[%s1211_s3 + $0x70] sm:$0xff]  ;;  %v524_v7 = vld [vmem:[%s1211_s3 + $0x68] sm:$0xff] }
  0x38   : > { %481 = vmatpush2.msra.mxu1 %v343_v23  ;;  %411 = vmatprep.subr.mxu0 %v278_v24  ;;  %v523_v8 = vld [vmem:[%s1211_s3 + $0x60] sm:$0xff]  ;;  %v522_v9 = vld [vmem:[%s1211_s3 + $0x58] sm:$0xff]  ;;  %v521_v10 = vld [vmem:[%s1211_s3 + $0x50] sm:$0xff] }
  0x39   : > { %482 = vmatprep.subr.mxu1 %v342_v25  ;;  %412 = vmatpush2.msra.mxu0 %v277_v26  ;;  %v520_v11 = vld [vmem:[%s1211_s3 + $0x48] sm:$0xff]  ;;  %v519_v12 = vld [vmem:[%s1211_s3 + $0x40] sm:$0xff]  ;;  %v518_v13 = vld [vmem:[%s1211_s3 + $0x38] sm:$0xff]  ;;  %v357_v25 = vlaneseq }
  0x3a   : > { %483 = vmatpush2.msra.mxu1 %v341_v27  ;;  %413 = vmatprep.subr.mxu0 %v276_v28  ;;  %v517_v14 = vld [vmem:[%s1211_s3 + $0x30] sm:$0xff]  ;;  %v516_v15 = vld [vmem:[%s1211_s3 + $0x28] sm:$0xff]  ;;  %v515_v16 = vld [vmem:[%s1211_s3 + $0x20] sm:$0xff] }
  0x3b   : > { %484 = vmatprep.subr.mxu1 %v340_v29  ;;  %414 = vmatpush2.msra.mxu0 %v275_v30  ;;  %v514_v17 = vld [vmem:[%s1211_s3 + $0x18] sm:$0xff]  ;;  %v513_v18 = vld [vmem:[%s1211_s3 + $0x10] sm:$0xff]  ;;  %v512_v19 = vld [vmem:[%s1211_s3 + $0x8] sm:$0xff]  ;;  %v358_v26 = vshrl.u32 %v357_v25, 7 }
  0x3c   : > { %485 = vmatpush2.msra.mxu1 %v339_v31  ;;  %415 = vmatprep.subr.mxu0 %v274_v32  ;;  %v511_v20 = vld [vmem:[%s1211_s3] sm:$0xff]  ;;  %v530_v21 = vld [vmem:[%s1211_s3 + $0x98] sm:$0xff]  ;;  %v529_v22 = vld [vmem:[%s1211_s3 + $0x90] sm:$0xff] }
  0x3d   : > { %486 = vmatprep.subr.mxu1 %v338_v33  ;;  %416 = vmatpush2.msra.mxu0 %v273_v34  ;;  %v528_v23 = vld [vmem:[%s1211_s3 + $0x88] sm:$0xff]  ;;  %v527_v24 = vld [vmem:[%s1211_s3 + $0x80] sm:$0xff]  ;;  %v359_v27 = vsub.s32 0, %v358_v26  ;;  %v363_v29 = vsub.s32 1, %v358_v26 }
  0x3e   : > { %487 = vmatpush2.msra.mxu1 %v337_v35  ;;  %417 = vmatprep.subr.mxu0 %v272_v36  ;;  %v355_v28 = vld [vmem:[%s1210_s2] sm:$0x3] }
  0x3f   : > { %488 = vmatprep.subr.mxu1 %v336_v37  ;;  %418 = vmatpush2.msra.mxu0 %v271_v38  ;;  %v360_v30 = vrot.slane %v355_v28, %v359_v27  ;;  %v364_v31 = vrot.slane %v355_v28, %v363_v29 }
  0x40   : > { %489 = vmatpush2.msra.mxu1 %v335_v39  ;;  %419 = vmatprep.subr.mxu0 %v270_v40 }
  0x41   : > { %490 = vmatprep.subr.mxu1 %v334_v41  ;;  %420 = vmatpush2.msra.mxu0 %v269_v42  ;;  %v674_v42 = vld [vmem:[%s1212_s4] ss:$0 sm:$0xff] }
  0x42   : > { %491 = vmatpush2.msra.mxu1 %v333_v43  ;;  %421 = vmatprep.subr.mxu0 %v268_v44 }
  0x43   : > { %492 = vmatprep.subr.mxu1 %v332_v45  ;;  %422 = vmatpush2.msra.mxu0 %v267_v46 }
  0x44   : > { %493 = vmatpush2.msra.mxu1 %v331_v47  ;;  %423 = vmatprep.subr.mxu0 %v266_v48 }
  0x45   : > { %494 = vmatprep.subr.mxu1 %v330_v49  ;;  %424 = vmatpush2.msra.mxu0 %v265_v50 }
  0x46   : > { %495 = vmatpush2.msra.mxu1 %v329_v51  ;;  %425 = vmatprep.subr.mxu0 %v264_v52 }
  0x47   : > { %496 = vmatprep.subr.mxu1 %v328_v53  ;;  %426 = vmatpush2.msra.mxu0 %v263_v54 }
  0x48   : > { %497 = vmatpush2.msra.mxu1 %v327_v55  ;;  %427 = vmatprep.subr.mxu0 %v262_v56 }
  0x49   : > { %498 = vmatprep.subr.mxu1 %v326_v57  ;;  %428 = vmatpush2.msra.mxu0 %v261_v58 }
  0x4a   : > { %499 = vmatpush2.msra.mxu1 %v325_v59  ;;  %429 = vmatprep.subr.mxu0 %v260_v60 }
  0x4b   : > { %500 = vmatprep.subr.mxu1 %v324_v61  ;;  %430 = vmatpush2.msra.mxu0 %v259_v62 }
  0x4c   : > { %431 = vmatprep.mubr.f32.mxu0 %v224_v63  ;;  %501 = vmatpush2.msra.mxu1 %v323_v0 }
  0x4d   : > { %502 = vmatprep.mubr.f32.mxu1 %v226_v1  ;;  %432 = vmatmul.mubr.f32.vlgmr.msra.gmra.mxu0 %v223_v2 }
  0x4e   : > { %503 = vmatmul.mubr.f32.vlgmr.msra.gmra.mxu1 %v225_v3  ;;  %542 = vmatprep.subr.mxu0 %v696_v5 }
  0x4f   : > { %543 = vmatpush1.msra.mxu0 %v526_v4 }
  0x50   : > { %544 = vmatprep.subr.mxu0 %v696_v5 }
  0x51   : > { %545 = vmatpush1.msra.mxu0 %v525_v6 }
  0x52   : > { %546 = vmatprep.subr.mxu0 %v696_v5 }
  0x53   : > { %547 = vmatpush1.msra.mxu0 %v524_v7 }
  0x54   : > { %548 = vmatprep.subr.mxu0 %v696_v5 }
  0x55   : > { %549 = vmatpush1.msra.mxu0 %v523_v8 }
  0x56   : > { %550 = vmatprep.subr.mxu0 %v696_v5 }
  0x57   : > { %551 = vmatpush1.msra.mxu0 %v522_v9 }
  0x58   : > { %552 = vmatprep.subr.mxu0 %v696_v5 }
  0x59   : > { %553 = vmatpush1.msra.mxu0 %v521_v10 }
  0x5a   : > { %554 = vmatprep.subr.mxu0 %v696_v5 }
  0x5b   : > { %555 = vmatpush1.msra.mxu0 %v520_v11 }
  0x5c   : > { %556 = vmatprep.subr.mxu0 %v696_v5 }
  0x5d   : > { %557 = vmatpush1.msra.mxu0 %v519_v12 }
  0x5e   : > { %558 = vmatprep.subr.mxu0 %v696_v5 }
  0x5f   : > { %559 = vmatpush1.msra.mxu0 %v518_v13 }
  0x60   : > { %560 = vmatprep.subr.mxu0 %v696_v5 }
  0x61   : > { %561 = vmatpush1.msra.mxu0 %v517_v14 }
  0x62   : > { %562 = vmatprep.subr.mxu0 %v696_v5 }
  0x63   : > { %563 = vmatpush1.msra.mxu0 %v516_v15 }
  0x64   : > { %564 = vmatprep.subr.mxu0 %v696_v5 }
  0x65   : > { %565 = vmatpush1.msra.mxu0 %v515_v16 }
  0x66   : > { %566 = vmatprep.subr.mxu0 %v696_v5 }
  0x67   : > { %567 = vmatpush1.msra.mxu0 %v514_v17 }
  0x68   : > { %568 = vmatprep.subr.mxu0 %v696_v5 }
  0x69   : > { %569 = vmatpush1.msra.mxu0 %v513_v18 }
  0x6a   : > { %570 = vmatprep.subr.mxu0 %v696_v5 }
  0x6b   : > { %571 = vmatpush1.msra.mxu0 %v512_v19 }
  0x6c   : > { %572 = vmatprep.subr.mxu0 %v696_v5 }
  0x6d   : > { %573 = vmatpush1.msra.mxu0 %v511_v20 }
  0x6e   : > { %598 = vmatprep.subr.mxu0 %v696_v5 }
  0x6f   : > { %599 = vmatpush2.msra.mxu0 %v530_v21 }
  0x70   : > { %600 = vmatprep.subr.mxu0 %v696_v5 }
  0x71   : > { %601 = vmatpush2.msra.mxu0 %v529_v22 }
  0x72   : > { %602 = vmatprep.subr.mxu0 %v696_v5 }
  0x73   : > { %603 = vmatpush2.msra.mxu0 %v528_v23 }
  0x74   : > { %604 = vmatprep.subr.mxu0 %v696_v5 }
  0x75   : > { %605 = vmatpush2.msra.mxu0 %v527_v24 }
 0x10d   : > { %v433_v32 = vpop.f32.mrf.mxu0 }
 0x10e   : > { %v504_v33 = vpop.f32.mrf.mxu1  ;;  %v434_v34 = vadd.f32 %v433_v32, %v360_v30 }
 0x10f   : > { %v435_v35 = vpop.f32.mrf.mxu0 }
 0x110   : > { %v436_v36 = vadd.f32 %v435_v35, %v364_v31  ;;  %v505_v37 = vadd.f32 %v504_v33, %v434_v34  ;;  %v506_v38 = vpop.f32.mrf.mxu1 }
 0x112   : > { %v507_v39 = vadd.f32 %v506_v38, %v436_v36  ;;  %v509_v41 = vmax.f32 %v505_v37, 0.0 }
 0x114   : > { %v510_v40 = vmax.f32 %v507_v39, 0.0 }
 0x116   : > { %675 = vmatprep.mubr.msk.f32.mxu0 %vm538_vm0, %v510_v40 }
 0x117   : > { %607 = vmatmul.mubr.f32.vlgmr.msra.gmra.mxu0 %v509_v41 }
 0x1d7   : > { %v608_v43 = vpop.f32.mrf.mxu0 }
 0x1d8   : > { %v609_v44 = vadd.f32 %v674_v42, %v608_v43 }
 0x1d9   : > { %v610_v45 = vpop.f32.mrf.mxu0 }
 0x1da   : > { %612 = vst [vmem:[%s222_s29] sm:$0xff] %v609_v44 }
 0x1db PF: > { %s15_s18 = sadd.s32 1, %s694_s18  }
 0x1dc   : > { %p12_p4 = scmp.ge.s32.totalorder %s15_s18, 4  }
 0x1de   :  { %14 = sbr.rel (!%p12_p4) target bundleno = 1 (0x1), region = 70 }

</bundles_post_ra>
